<compile_context>
chip_gen: v7x
topology: tpu7x:2x2x1
jax: 0.10.0
libtpu: 0.0.40
codegen_flags: <defaults>
</compile_context>

<pallas_src>
import functools

import jax
import jax.numpy as jnp
from jax import lax
from jax.experimental import pallas as pl
from jax.experimental.pallas import tpu as pltpu

LANE = 128


def _round_up(a: int, b: int) -> int:
    return (a + b - 1) // b * b


def _cdiv(a: int, b: int) -> int:
    return (a + b - 1) // b


_VMEM_CAP_CACHE = None


def _vmem_cap_bytes() -> int:
    """Usable scoped-VMEM ceiling: chip capacity minus ~8 MiB headroom."""
    global _VMEM_CAP_CACHE
    if _VMEM_CAP_CACHE is None:
        try:
            cap = int(pltpu.get_tpu_info().vmem_capacity_bytes)
        except Exception:          # query unavailable -> assume smallest (v7x)
            cap = 64 << 20
        _VMEM_CAP_CACHE = max(cap - (8 << 20), 16 << 20)
    return _VMEM_CAP_CACHE


def _vmem_buf_bytes(block_shape, dtype) -> int:
    """Bytes of ONE VMEM buffer for `block_shape` (last two dims tile-padded)."""
    itemsize = jnp.dtype(dtype).itemsize
    sub = {4: 8, 2: 16, 1: 32}.get(itemsize, 8)
    shape = list(block_shape)
    if len(shape) == 1:
        shape = [1] + shape
    shape[-1] = _round_up(int(shape[-1]), LANE)
    shape[-2] = _round_up(int(shape[-2]), sub)
    n = 1
    for s in shape:
        n *= int(s)
    return n * itemsize


def _vmem_limit(buffer_bytes: int) -> int:
    # Exact per-buffer accounting + headroom, clamped to chip capacity
    # (64 MiB/TensorCore on v7x, 128 MiB on v5e/v6e).
    return int(min(_vmem_cap_bytes(), max(buffer_bytes + (4 << 20), 32 << 20)))


# ---------------------------------------------------------------------------
# Path A kernel: folded-K GEMM (small C_in).  Single MXU pass per row tile.
# ---------------------------------------------------------------------------
def _gemm_bias_relu_kernel(p_ref, w_ref, b_ref, o_ref):
    """p_ref: (TM, K_pad)  w_ref: (K_pad, C_out_pad)  b_ref: (1, C_out_pad) f32
    o_ref: (TM, C_out_pad)"""
    acc = jnp.dot(p_ref[...], w_ref[...], preferred_element_type=jnp.float32)
    o_ref[...] = jnp.maximum(acc + b_ref[...], 0.0).astype(o_ref.dtype)


# ---------------------------------------------------------------------------
# Path B kernel: in-kernel taps with a VMEM f32 accumulator (deep C_in).
# ---------------------------------------------------------------------------
def _tap_conv_bias_relu_kernel(x_ref, w_ref, b_ref, o_ref, acc_ref, *,
                               k, stride, dilation, th, wo_pad):
    """x_ref:   (1, Hp, Wp, C_in_pad)       padded NHWC image (compute dtype)
    w_ref:   (k*k, C_in_pad, C_out_pad)  BN-folded weight taps
    b_ref:   (1, C_out_pad)              folded BN bias (f32)
    o_ref:   (1, TH*Wo_pad, C_out_pad)   output rows for this block
    acc_ref: (TH*Wo_pad, C_out_pad)      f32 VMEM accumulator (scratch)"""
    r = pl.program_id(1)
    row0 = pl.multiple_of(r * (th * stride), th * stride)
    c_in = x_ref.shape[3]
    m = th * wo_pad

    acc_ref[...] = jnp.zeros_like(acc_ref)
    # Contraction depth per tap is C_in_pad >= 128, so each matmul feeds the
    # MXU well; the accumulator lives in VMEM so vreg pressure stays bounded.
    for t in range(k * k):
        i, j = divmod(t, k)
        if stride == 1:
            xs = x_ref[0, pl.ds(row0 + i * dilation, th),
                          pl.ds(j * dilation, wo_pad), :]
        else:
            # TODO(synk): stride > 1 here uses a strided sublane read; folding
            #             the stride phases into channels (space-to-depth)
            #             would make these reads contiguous.
            xs = x_ref[0, pl.ds(row0 + i * dilation, th, stride),
                          pl.ds(j * dilation, wo_pad, stride), :]
        acc_ref[...] += jnp.dot(xs.reshape(m, c_in), w_ref[t],
                                preferred_element_type=jnp.float32)

    o_ref[0, :, :] = jnp.maximum(acc_ref[...] + b_ref[...],
                                 0.0).astype(o_ref.dtype)


@functools.partial(
    jax.jit,
    static_argnames=("kernel_size", "stride", "padding", "dilation",
                     "compute_dtype"))
def basic_conv_forward(x, conv_weight, bn_gamma, bn_beta, bn_mean, bn_var, *,
                       kernel_size, stride=1, padding=0, dilation=1, eps=1e-5,
                       compute_dtype=jnp.bfloat16):
    """BasicConv forward: Conv2d(no bias, groups=1) -> BatchNorm2d(eval) -> ReLU.

    NCHW in / NCHW out, matching the PyTorch module defaults
    (relu=True, bn=True, bias=False).
    """
    N, C_in, H, W = x.shape
    C_out = conv_weight.shape[0]
    k = int(kernel_size)

    Ho = (H + 2 * padding - dilation * (k - 1) - 1) // stride + 1
    Wo = (W + 2 * padding - dilation * (k - 1) - 1) // stride + 1
    C_out_pad = _round_up(C_out, LANE)   # lane-dense output stores / MXU cols

    # Fold eval-mode BN: scale into the weight, bias stays in the epilogue.
    scale = bn_gamma / jnp.sqrt(bn_var + eps)                 # [C_out]
    bias = bn_beta - bn_mean * scale                          # [C_out]
    w_folded = conv_weight * scale[:, None, None, None]       # [C_out,C_in,k,k]
    bias_pad = jnp.pad(bias, (0, C_out_pad - C_out)).reshape(1, C_out_pad)
    bias_pad = bias_pad.astype(jnp.float32)

    x_nhwc = jnp.transpose(x, (0, 2, 3, 1))                   # NCHW -> NHWC
    # (kh, kw, C_in, C_out): tap-major / channel-minor — matches the patch /
    # tap ordering used by both kernel paths.
    w_taps = jnp.transpose(w_folded, (2, 3, 1, 0))

    itemsize_c = jnp.dtype(compute_dtype).itemsize
    itemsize_o = jnp.dtype(x.dtype).itemsize

    if C_in < LANE and k * k * C_in <= 4096:
        # ------------------- Path A: folded-K GEMM --------------------------
        K_eff = k * k * C_in
        K_pad = _round_up(K_eff, 8)

        x_sp = jnp.pad(x_nhwc, ((0, 0), (padding, padding),
                                (padding, padding), (0, 0)))
        taps = []
        for i in range(k):
            for j in range(k):
                h0, w0 = i * dilation, j * dilation
                taps.append(lax.slice(
                    x_sp,
                    (0, h0, w0, 0),
                    (N, h0 + (Ho - 1) * stride + 1,
                     w0 + (Wo - 1) * stride + 1, C_in),
                    (1, stride, stride, 1)))           # (N, Ho, Wo, C_in)
        patches = jnp.concatenate(taps, axis=-1)       # (N, Ho, Wo, K_eff)

        M_total = N * Ho * Wo
        TM = min(256, _round_up(M_total, 8))           # ~256-row tiles
        M_pad = _round_up(M_total, TM)

        p2d = patches.reshape(M_total, K_eff)
        p2d = jnp.pad(p2d, ((0, M_pad - M_total), (0, K_pad - K_eff)))
        p2d = p2d.astype(compute_dtype)

        w2d = w_taps.reshape(k * k * C_in, C_out)
        w2d = jnp.pad(w2d, ((0, K_pad - K_eff), (0, C_out_pad - C_out)))
        w2d = w2d.astype(compute_dtype)

        need = 2 * (_vmem_buf_bytes((TM, K_pad), compute_dtype)
                    + _vmem_buf_bytes((K_pad, C_out_pad), compute_dtype)
                    + _vmem_buf_bytes((1, C_out_pad), jnp.float32)
                    + _vmem_buf_bytes((TM, C_out_pad), x.dtype))
        flops = 2 * M_pad * K_pad * C_out_pad
        bytes_accessed = (M_pad * K_pad * itemsize_c
                          + K_pad * C_out_pad * itemsize_c
                          + C_out_pad * 4
                          + M_pad * C_out_pad * itemsize_o)

        out = pl.pallas_call(
            _gemm_bias_relu_kernel,
            out_shape=jax.ShapeDtypeStruct((M_pad, C_out_pad), x.dtype),
            grid_spec=pltpu.PrefetchScalarGridSpec(
                num_scalar_prefetch=0,
                grid=(M_pad // TM,),
                in_specs=[
                    pl.BlockSpec((TM, K_pad), lambda m: (m, 0)),
                    # Weight / bias blocks are grid-constant: Pallas re-uses
                    # the VMEM copy across steps.  (Single-buffering them is a
                    # further VMEM saving for very large weights; tiny here.)
                    pl.BlockSpec((K_pad, C_out_pad), lambda m: (0, 0)),
                    pl.BlockSpec((1, C_out_pad), lambda m: (0, 0)),
                ],
                out_specs=pl.BlockSpec((TM, C_out_pad), lambda m: (m, 0)),
            ),
            compiler_params=pltpu.CompilerParams(
                dimension_semantics=("parallel",),
                vmem_limit_bytes=_vmem_limit(need),
            ),
            cost_estimate=pl.CostEstimate(
                flops=flops, transcendentals=0, bytes_accessed=bytes_accessed),
        )(p2d, w2d, bias_pad)

        out = out[:M_total, :C_out].reshape(N, Ho, Wo, C_out)
        return jnp.transpose(out, (0, 3, 1, 2))

    # ----------------------- Path B: in-kernel taps --------------------------
    C_in_pad = _round_up(C_in, 8)        # >= 128 here, already lane-dense
    Wo_pad = _round_up(Wo, 16)           # keeps in-kernel reshape a layout no-op
    TH = max(1, min(Ho, 256 // Wo_pad))  # ~256-row tiles
    RB = _cdiv(Ho, TH)
    Ho_pad = RB * TH

    # Padded extents so every in-kernel read stays in bounds.
    Hp = max(H + 2 * padding, (Ho_pad - 1) * stride + dilation * (k - 1) + 1)
    Wp = max(W + 2 * padding, (Wo_pad - 1) * stride + dilation * (k - 1) + 1)

    x_pad = jnp.pad(
        x_nhwc,
        ((0, 0),
         (padding, Hp - H - padding),
         (padding, Wp - W - padding),
         (0, C_in_pad - C_in))).astype(compute_dtype)

    w_tap = w_taps.reshape(k * k, C_in, C_out)
    w_tap = jnp.pad(w_tap, ((0, 0), (0, C_in_pad - C_in),
                            (0, C_out_pad - C_out))).astype(compute_dtype)

    kernel = functools.partial(
        _tap_conv_bias_relu_kernel,
        k=k, stride=stride, dilation=dilation, th=TH, wo_pad=Wo_pad)

    M = TH * Wo_pad
    need = (2 * _vmem_buf_bytes((Hp, Wp, C_in_pad), compute_dtype)
            + 2 * _vmem_buf_bytes((k * k, C_in_pad, C_out_pad), compute_dtype)
            + 2 * _vmem_buf_bytes((1, C_out_pad), jnp.float32)
            + 2 * _vmem_buf_bytes((M, C_out_pad), x.dtype)
            + _vmem_buf_bytes((M, C_out_pad), jnp.float32))   # scratch, 1 buf
    flops = 2 * N * RB * (k * k) * M * C_in_pad * C_out_pad
    bytes_accessed = (N * Hp * Wp * C_in_pad * itemsize_c
                      + k * k * C_in_pad * C_out_pad * itemsize_c
                      + N * Ho_pad * Wo_pad * C_out_pad * itemsize_o)

    out = pl.pallas_call(
        kernel,
        out_shape=jax.ShapeDtypeStruct((N, Ho_pad * Wo_pad, C_out_pad),
                                       x.dtype),
        grid_spec=pltpu.PrefetchScalarGridSpec(
            num_scalar_prefetch=0,
            grid=(N, RB),
            in_specs=[
                # Whole padded image resident per batch; constant over r, so
                # the VMEM copy is reused across row blocks.
                # TODO(synk): stream (TH*stride + (k-1)*dilation)-row slabs
                #             with a halo so x VMEM scales with the tile
                #             (needed for large images on v7x's 64 MiB).
                pl.BlockSpec((1, Hp, Wp, C_in_pad), lambda n, r: (n, 0, 0, 0)),
                pl.BlockSpec((k * k, C_in_pad, C_out_pad),
                             lambda n, r: (0, 0, 0)),
                pl.BlockSpec((1, C_out_pad), lambda n, r: (0, 0)),
            ],
            out_specs=pl.BlockSpec((1, TH * Wo_pad, C_out_pad),
                                   lambda n, r: (n, r, 0)),
            scratch_shapes=[pltpu.VMEM((M, C_out_pad), jnp.float32)],
        ),
        compiler_params=pltpu.CompilerParams(
            # Batch axis "parallel": on v7x the two TensorCores split the
            # batch, so they do not both DMA the same resident image.
            dimension_semantics=("parallel", "arbitrary"),
            vmem_limit_bytes=_vmem_limit(need),
        ),
        cost_estimate=pl.CostEstimate(
            flops=flops, transcendentals=0, bytes_accessed=bytes_accessed),
    )(x_pad, w_tap, bias_pad)

    out = out.reshape(N, Ho_pad, Wo_pad, C_out_pad)[:, :Ho, :Wo, :C_out]
    return jnp.transpose(out, (0, 3, 1, 2))


def _reference_forward(x, w, gamma, beta, mean, var, *, stride, padding,
                       dilation, eps=1e-5):
    y = lax.conv_general_dilated(
        x, w,
        window_strides=(stride, stride),
        padding=[(padding, padding), (padding, padding)],
        rhs_dilation=(dilation, dilation),
        dimension_numbers=("NCHW", "OIHW", "NCHW"),
    )
    scale = gamma / jnp.sqrt(var + eps)
    bias = beta - mean * scale
    y = y * scale[None, :, None, None] + bias[None, :, None, None]
    return jnp.maximum(y, 0.0)


if __name__ == "__main__":
    master = jax.random.PRNGKey(0)

    def _check(name, *, N, C_in, H, W, C_out, ksize, stride, padding,
               dilation, compute_dtype, atol, rtol, seed):
        keys = jax.random.split(jax.random.fold_in(master, seed), 6)
        x = jax.random.normal(keys[0], (N, C_in, H, W), jnp.float32)
        w = jax.random.normal(keys[1], (C_out, C_in, ksize, ksize),
                              jnp.float32) * 0.1
        gamma = 1.0 + 0.1 * jax.random.normal(keys[2], (C_out,), jnp.float32)
        beta = 0.1 * jax.random.normal(keys[3], (C_out,), jnp.float32)
        mean = 0.1 * jax.random.normal(keys[4], (C_out,), jnp.float32)
        var = jnp.abs(1.0 + 0.1 * jax.random.normal(keys[5], (C_out,),
                                                    jnp.float32))

        out = basic_conv_forward(
            x, w, gamma, beta, mean, var,
            kernel_size=ksize, stride=stride, padding=padding,
            dilation=dilation, compute_dtype=compute_dtype)
        out = jax.block_until_ready(out)
        ref = _reference_forward(x, w, gamma, beta, mean, var, stride=stride,
                                 padding=padding, dilation=dilation)

        Ho = (H + 2 * padding - dilation * (ksize - 1) - 1) // stride + 1
        Wo = (W + 2 * padding - dilation * (ksize - 1) - 1) // stride + 1
        assert out.shape == (N, C_out, Ho, Wo), (name, out.shape)
        err = float(jnp.max(jnp.abs(out - ref)))
        assert jnp.allclose(out, ref, atol=atol, rtol=rtol), (name, err)

    # BasicConv(4, 8, kernel_size=3, stride=1, padding=1): folded-K path.
    _check("small_cin_bf16", N=2, C_in=4, H=16, W=16, C_out=8, ksize=3,
           stride=1, padding=1, dilation=1, compute_dtype=jnp.bfloat16,
           atol=3e-2, rtol=3e-2, seed=1)
    _check("small_cin_f32", N=2, C_in=4, H=16, W=16, C_out=8, ksize=3,
           stride=1, padding=1, dilation=1, compute_dtype=jnp.float32,
           atol=1e-4, rtol=1e-4, seed=1)
    # Stride-2 variant (stride folded into the wrapper patch extraction).
    _check("small_cin_stride2_f32", N=2, C_in=4, H=16, W=16, C_out=8, ksize=3,
           stride=2, padding=1, dilation=1, compute_dtype=jnp.float32,
           atol=1e-4, rtol=1e-4, seed=2)
    # Deep-C_in variant exercising the in-kernel tap path + VMEM accumulator.
    _check("deep_cin_tap_f32", N=1, C_in=128, H=8, W=8, C_out=16, ksize=3,
           stride=1, padding=1, dilation=1, compute_dtype=jnp.float32,
           atol=1e-3, rtol=1e-3, seed=3)

    print("KERNEL_OK")
</pallas_src>

<mosaic_0001>
module attributes {stable_mosaic.version = 11 : i64} {
  func.func @_gemm_bias_relu_kernel(%arg0: i32, %arg1: memref<256x40xbf16, #tpu.memory_space<vmem>>, %arg2: memref<40x128xbf16, #tpu.memory_space<vmem>>, %arg3: memref<1x128xf32, #tpu.memory_space<vmem>>, %arg4: memref<256x128xf32, #tpu.memory_space<vmem>>) attributes {dimension_semantics = [#tpu.dimension_semantics<parallel>], iteration_bounds = array<i64: 2>, scalar_prefetch = 0 : i64, scratch_operands = 0 : i64, tpu.core_type = #tpu.core_type<tc>, window_params = [{transform_indices = @transform_0, window_bounds = array<i64: 256, 40>}, {pipeline_mode = #tpu.pipeline_mode<synchronous>, transform_indices = @transform_1, window_bounds = array<i64: 40, 128>}, {pipeline_mode = #tpu.pipeline_mode<synchronous>, transform_indices = @transform_2, window_bounds = array<i64: 1, 128>}, {transform_indices = @transform_3, window_bounds = array<i64: 256, 128>}]} {
    %c0 = arith.constant 0 : index
    %c0_0 = arith.constant 0 : index
    %0 = vector.load %arg1[%c0, %c0_0] : memref<256x40xbf16, #tpu.memory_space<vmem>>, vector<256x40xbf16>
    %c0_1 = arith.constant 0 : index
    %c0_2 = arith.constant 0 : index
    %1 = vector.load %arg2[%c0_1, %c0_2] : memref<40x128xbf16, #tpu.memory_space<vmem>>, vector<40x128xbf16>
    %cst = arith.constant dense<0.000000e+00> : vector<256x128xf32>
    %2 = tpu.matmul %0, %1, %cst {dimension_numbers = #tpu.dot_dimension_numbers<[1], [0], [0], [1], [0, 0, 1, 1], [], []>} : vector<256x40xbf16>, vector<40x128xbf16>, vector<256x128xf32> -> vector<256x128xf32>
    %c0_3 = arith.constant 0 : index
    %c0_4 = arith.constant 0 : index
    %3 = vector.load %arg3[%c0_3, %c0_4] : memref<1x128xf32, #tpu.memory_space<vmem>>, vector<1x128xf32>
    %4 = vector.broadcast %3 : vector<1x128xf32> to vector<256x128xf32>
    %5 = arith.addf %2, %4 : vector<256x128xf32>
    %cst_5 = arith.constant 0.000000e+00 : f32
    %6 = vector.broadcast %cst_5 : f32 to vector<256x128xf32>
    %7 = arith.maximumf %5, %6 : vector<256x128xf32>
    %c0_6 = arith.constant 0 : index
    %c0_7 = arith.constant 0 : index
    %8 = vector.load %arg4[%c0_6, %c0_7] : memref<256x128xf32, #tpu.memory_space<vmem>>, vector<256x128xf32>
    tpu.vector_store %arg4[%c0_6, %c0_7], %7 {strides = array<i32>} : memref<256x128xf32, #tpu.memory_space<vmem>>, vector<256x128xf32>,
    return
  }
  func.func @transform_0(%arg0: i32) -> (i32, i32) {
    %c0_i32 = arith.constant 0 : i32
    %c0_i32_0 = arith.constant 0 : i32
    return %arg0, %c0_i32 : i32, i32
  }
  func.func @transform_1(%arg0: i32) -> (i32, i32) {
    %c0_i32 = arith.constant 0 : i32
    %c0_i32_0 = arith.constant 0 : i32
    %c0_i32_1 = arith.constant 0 : i32
    return %c0_i32, %c0_i32_0 : i32, i32
  }
  func.func @transform_2(%arg0: i32) -> (i32, i32) {
    %c0_i32 = arith.constant 0 : i32
    %c0_i32_0 = arith.constant 0 : i32
    %c0_i32_1 = arith.constant 0 : i32
    return %c0_i32, %c0_i32_0 : i32, i32
  }
  func.func @transform_3(%arg0: i32) -> (i32, i32) {
    %c0_i32 = arith.constant 0 : i32
    %c0_i32_0 = arith.constant 0 : i32
    return %arg0, %c0_i32 : i32, i32
  }
}

</mosaic_0001>

<bundles_post_ra>
// kernel: basic_conv_forward.1
= control target key start
LH: loop header
LB: loop body
LE: loop exit
PB: predicated region body
PF: predicated region fallthrough
CT: control target
= control target key end

     0   :  { %s815_s12 = smov 0   ;;  %s950_s0 = inlined_call_operand.vmem [shape: bf16[512,40], index: 0, kind: input, shape index: {}]   ;;  %s951_s1 = inlined_call_operand.vmem [shape: bf16[40,128], index: 1, kind: input, shape index: {}]   ;;  %s952_s2 = inlined_call_operand.vmem [shape: f32[1,128], index: 2, kind: input, shape index: {}]   ;;  %s953_s3 = inlined_call_operand.vmem [shape: f32[512,128], index: 3, kind: output, shape index: {}]  }
   0x1 LB: > { %s648_s13 = sadd.s32 4294967295, %s793_s12   ;;  %p652_p0 = scmp.ge.s32.totalorder %s793_s12, 1  ;;  %s793_s12 = sphi %s815_s12, %s13_s12  }
   0x2   : > { %p138_p1 = scmp.lt.s32.totalorder %s793_s12, 3 }
   0x4   : > { %p139_p2 = pnand %p652_p0, %p138_p1 }
   0x5   : > { %v768_v0 = vld [vmem:[%s951_s1] sm:$0xff] (!%p139_p2)   ;;  %v769_v1 = vld [vmem:[%s951_s1 + $0x8] sm:$0xff] (!%p139_p2)   ;;  %s653_s18 = sshll.u32 (!%p139_p2), %s648_s13, 5  ;;  %v770_v2 = vld [vmem:[%s951_s1 + $0x10] ss:$0 sps:$4 sm:$0xff] (!%p139_p2)   ;;  %vm363_vm0 = vcmask (!%p139_p2), 1043456  }
   0x6   : > { %142 = sbr.rel (%p139_p2) target bundleno = 263 (0x107), region = 32  ;;  %714 = vmatprep.subr.bf16.mxu0 (!%p139_p2), %v768_v0  ;;  %752 = vmatprep.subr.bf16.mxu1 (!%p139_p2), %v768_v0  ;;  %p163_p3 = scmp.lt.s32.totalorder (!%p139_p2), %s653_s18, 63  ;;  %vm314_vm1 = vcmask (!%p139_p2), 326656   ;;  %v365_v3 = vsel (!%p139_p2), %vm363_vm0, %v770_v2, 0  ;;  %v875_v20 = vld [vmem:[%s952_s2] ss:$0 sm:$0xff] (!%p139_p2) }
   0x7   : > { %715 = vmatpush3.bf16.msra.mxu0 (!%p139_p2), %v768_v0  ;;  %755 = vmatpush3.bf16.msra.mxu1 (!%p139_p2), %v768_v0 }
   0x8   : > { %716 = vmatprep.subr.bf16.mxu0 (!%p139_p2), %v769_v1  ;;  %753 = vmatprep.subr.bf16.mxu1 (!%p139_p2), %v769_v1 }
   0xb   : > { %717 = vmatpush3.bf16.msra.mxu0 (!%p139_p2), %v769_v1  ;;  %756 = vmatpush3.bf16.msra.mxu1 (!%p139_p2), %v769_v1 }
   0xc   : > { %758 = vmatprep.subr.msk.bf16.mxu0 (!%p139_p2), %vm363_vm0, %v770_v2  ;;  %759 = vmatprep.subr.msk.bf16.mxu1 (!%p139_p2), %vm363_vm0, %v770_v2 }
   0xd   : > { %s955_s18 = smov (!%p163_p3, %s653_s18), 63 }
   0xe   : > { %s654_s21 = sshll.u32 %s955_s18, 2  ;;  %s656_s27 = sshll.u32 %s955_s18, 3 }
   0xf   : > { %s838_s24 = scalar_lea.vmem %s950_s0, %s654_s21  ;;  %719 = vmatpush3.bf16.msra.mxu0 %v365_v3  ;;  %757 = vmatpush3.bf16.msra.mxu1 %v365_v3  ;;  %s883_s30 = scalar_lea.vmem %s953_s3, %s656_s27 }
  0x10   : > { %v771_v4 = vld [vmem:[%s838_s24] sm:$0xff]   ;;  %v773_v6 = vld [vmem:[%s838_s24 + $0x8] sm:$0xff]   ;;  %v775_v8 = vld [vmem:[%s838_s24 + $0x10] sm:$0xff]  }
  0x11   : > { %v772_v5 = vld [vmem:[%s838_s24 + $0x40] sm:$0xff]   ;;  %720 = vmatprep.mubr.msk.bf16.mxu0 %vm314_vm1, %v771_v4  ;;  %v774_v7 = vld [vmem:[%s838_s24 + $0x48] sm:$0xff]   ;;  %v776_v9 = vld [vmem:[%s838_s24 + $0x50] sm:$0xff]  }
  0x12   : > { %736 = vmatprep.mubr.msk.bf16.mxu1 %vm314_vm1, %v772_v5  ;;  %721 = vmatmul.mubr.msk.bf16.vlgmr.msra.gmra.mrb[0].mxu0 %vm314_vm1, %v773_v6  ;;  %v777_v10 = vld [vmem:[%s838_s24 + $0x18] sm:$0xff]   ;;  %v779_v12 = vld [vmem:[%s838_s24 + $0x20] sm:$0xff]   ;;  %v781_v14 = vld [vmem:[%s838_s24 + $0x28] sm:$0xff]  }
  0x13   : > { %737 = vmatmul.mubr.msk.bf16.vlgmr.msra.gmra.mrb[0].mxu1 %vm314_vm1, %v774_v7  ;;  %724 = vmatprep.mubr.msk.bf16.mxu0 %vm314_vm1, %v775_v8  ;;  %v778_v11 = vld [vmem:[%s838_s24 + $0x58] sm:$0xff]   ;;  %v780_v13 = vld [vmem:[%s838_s24 + $0x60] sm:$0xff]   ;;  %v782_v15 = vld [vmem:[%s838_s24 + $0x68] sm:$0xff]  }
  0x14   : > { %740 = vmatprep.mubr.msk.bf16.mxu1 %vm314_vm1, %v776_v9  ;;  %v783_v16 = vld [vmem:[%s838_s24 + $0x30] sm:$0xff]   ;;  %v785_v18 = vld [vmem:[%s838_s24 + $0x38] sm:$0xff]  }
  0x15   : > { %v784_v17 = vld [vmem:[%s838_s24 + $0x70] sm:$0xff]   ;;  %v786_v19 = vld [vmem:[%s838_s24 + $0x78] sm:$0xff]  }
  0x1a   : > { %725 = vmatmul.mubr.msk.bf16.gmra.mrb[4].mxu0 %vm314_vm1, %v777_v10 }
  0x1b   : > { %741 = vmatmul.mubr.msk.bf16.gmra.mrb[4].mxu1 %vm314_vm1, %v778_v11  ;;  %728 = vmatprep.mubr.msk.bf16.mxu0 %vm314_vm1, %v779_v12 }
  0x1c   : > { %744 = vmatprep.mubr.msk.bf16.mxu1 %vm314_vm1, %v780_v13 }
  0x22   : > { %729 = vmatmul.mubr.msk.bf16.gmra.mrb[8].mxu0 %vm314_vm1, %v781_v14 }
  0x23   : > { %745 = vmatmul.mubr.msk.bf16.gmra.mrb[8].mxu1 %vm314_vm1, %v782_v15  ;;  %732 = vmatprep.mubr.msk.bf16.mxu0 %vm314_vm1, %v783_v16 }
  0x24   : > { %748 = vmatprep.mubr.msk.bf16.mxu1 %vm314_vm1, %v784_v17 }
  0x2a   : > { %733 = vmatmul.mubr.msk.bf16.gmra.mrb[12].mxu0 %vm314_vm1, %v785_v18 }
  0x2b   : > { %749 = vmatmul.mubr.msk.bf16.gmra.mrb[12].mxu1 %vm314_vm1, %v786_v19 }
  0xe5   : > { %v722_v21 = vpop.f32.mrb[0].mxu0 }
  0xe6   : > { %v738_v22 = vpop.f32.mrb[0].mxu1  ;;  %v410_v23 = vadd.f32 %v722_v21, %v875_v20  ;;  %v401_v25 = vpop.f32.mrb[1].mxu0 }
  0xe7   : > { %v474_v24 = vadd.f32 %v738_v22, %v875_v20  ;;  %v465_v26 = vpop.f32.mrb[1].mxu1  ;;  %v402_v27 = vadd.f32 %v875_v20, %v401_v25  ;;  %v723_v29 = vpop.f32.mrb[2].mxu0 }
  0xe8   : > { %v466_v28 = vadd.f32 %v875_v20, %v465_v26  ;;  %v739_v30 = vpop.f32.mrb[2].mxu1  ;;  %v530_v31 = vmax.f32 %v410_v23, 0.0  ;;  %v413_v33 = vadd.f32 %v723_v29, %v875_v20  ;;  %v404_v35 = vpop.f32.mrb[3].mxu0 }
  0xe9   : > { %v546_v32 = vmax.f32 %v474_v24, 0.0  ;;  %v477_v34 = vadd.f32 %v739_v30, %v875_v20  ;;  %v468_v36 = vpop.f32.mrb[3].mxu1  ;;  %v528_v37 = vmax.f32 %v402_v27, 0.0  ;;  %v405_v39 = vadd.f32 %v875_v20, %v404_v35 }
  0xea   : > { %v544_v38 = vmax.f32 %v466_v28, 0.0  ;;  %v469_v40 = vadd.f32 %v875_v20, %v468_v36  ;;  %562 = vst [vmem:[%s883_s30 + $0x10] sm:$0xff] %v530_v31  ;;  %v531_v41 = vmax.f32 %v413_v33, 0.0 }
  0xeb   : > { %578 = vst [vmem:[%s883_s30 + $0x90] sm:$0xff] %v546_v32  ;;  %v547_v42 = vmax.f32 %v477_v34, 0.0  ;;  %560 = vst [vmem:[%s883_s30] sm:$0xff] %v528_v37  ;;  %v529_v43 = vmax.f32 %v405_v39, 0.0 }
  0xec   : > { %576 = vst [vmem:[%s883_s30 + $0x80] sm:$0xff] %v544_v38  ;;  %v545_v44 = vmax.f32 %v469_v40, 0.0  ;;  %563 = vst [vmem:[%s883_s30 + $0x18] sm:$0xff] %v531_v41 }
  0xed   : > { %579 = vst [vmem:[%s883_s30 + $0x98] sm:$0xff] %v547_v42  ;;  %561 = vst [vmem:[%s883_s30 + $0x8] sm:$0xff] %v529_v43  ;;  %v726_v45 = vpop.f32.mrb[4].mxu0 }
  0xee   : > { %577 = vst [vmem:[%s883_s30 + $0x88] sm:$0xff] %v545_v44  ;;  %v742_v46 = vpop.f32.mrb[4].mxu1  ;;  %v426_v47 = vadd.f32 %v726_v45, %v875_v20  ;;  %v417_v49 = vpop.f32.mrb[5].mxu0 }
  0xef   : > { %v490_v48 = vadd.f32 %v742_v46, %v875_v20  ;;  %v481_v50 = vpop.f32.mrb[5].mxu1  ;;  %v418_v51 = vadd.f32 %v875_v20, %v417_v49  ;;  %v727_v53 = vpop.f32.mrb[6].mxu0 }
  0xf0   : > { %v482_v52 = vadd.f32 %v875_v20, %v481_v50  ;;  %v743_v54 = vpop.f32.mrb[6].mxu1  ;;  %v534_v55 = vmax.f32 %v426_v47, 0.0  ;;  %v429_v57 = vadd.f32 %v727_v53, %v875_v20  ;;  %v420_v59 = vpop.f32.mrb[7].mxu0 }
  0xf1   : > { %v550_v56 = vmax.f32 %v490_v48, 0.0  ;;  %v493_v58 = vadd.f32 %v743_v54, %v875_v20  ;;  %v484_v60 = vpop.f32.mrb[7].mxu1  ;;  %v532_v61 = vmax.f32 %v418_v51, 0.0  ;;  %v421_v63 = vadd.f32 %v875_v20, %v420_v59 }
  0xf2   : > { %v548_v62 = vmax.f32 %v482_v52, 0.0  ;;  %v485_v0 = vadd.f32 %v875_v20, %v484_v60  ;;  %566 = vst [vmem:[%s883_s30 + $0x30] sm:$0xff] %v534_v55  ;;  %v535_v1 = vmax.f32 %v429_v57, 0.0 }
  0xf3   : > { %582 = vst [vmem:[%s883_s30 + $0xb0] sm:$0xff] %v550_v56  ;;  %v551_v2 = vmax.f32 %v493_v58, 0.0  ;;  %564 = vst [vmem:[%s883_s30 + $0x20] sm:$0xff] %v532_v61  ;;  %v533_v3 = vmax.f32 %v421_v63, 0.0 }
  0xf4   : > { %580 = vst [vmem:[%s883_s30 + $0xa0] sm:$0xff] %v548_v62  ;;  %v549_v4 = vmax.f32 %v485_v0, 0.0  ;;  %567 = vst [vmem:[%s883_s30 + $0x38] sm:$0xff] %v535_v1 }
  0xf5   : > { %583 = vst [vmem:[%s883_s30 + $0xb8] sm:$0xff] %v551_v2  ;;  %565 = vst [vmem:[%s883_s30 + $0x28] sm:$0xff] %v533_v3  ;;  %v730_v5 = vpop.f32.mrb[8].mxu0 }
  0xf6   : > { %581 = vst [vmem:[%s883_s30 + $0xa8] sm:$0xff] %v549_v4  ;;  %v746_v6 = vpop.f32.mrb[8].mxu1  ;;  %v442_v7 = vadd.f32 %v730_v5, %v875_v20  ;;  %v433_v9 = vpop.f32.mrb[9].mxu0 }
  0xf7   : > { %v506_v8 = vadd.f32 %v746_v6, %v875_v20  ;;  %v497_v10 = vpop.f32.mrb[9].mxu1  ;;  %v434_v11 = vadd.f32 %v875_v20, %v433_v9  ;;  %v731_v13 = vpop.f32.mrb[10].mxu0 }
  0xf8   : > { %v498_v12 = vadd.f32 %v875_v20, %v497_v10  ;;  %v747_v14 = vpop.f32.mrb[10].mxu1  ;;  %v538_v15 = vmax.f32 %v442_v7, 0.0  ;;  %v445_v17 = vadd.f32 %v731_v13, %v875_v20  ;;  %v436_v19 = vpop.f32.mrb[11].mxu0 }
  0xf9   : > { %v554_v16 = vmax.f32 %v506_v8, 0.0  ;;  %v509_v18 = vadd.f32 %v747_v14, %v875_v20  ;;  %v500_v21 = vpop.f32.mrb[11].mxu1  ;;  %v536_v22 = vmax.f32 %v434_v11, 0.0  ;;  %v437_v24 = vadd.f32 %v875_v20, %v436_v19 }
  0xfa   : > { %v552_v23 = vmax.f32 %v498_v12, 0.0  ;;  %v501_v25 = vadd.f32 %v875_v20, %v500_v21  ;;  %570 = vst [vmem:[%s883_s30 + $0x50] sm:$0xff] %v538_v15  ;;  %v539_v26 = vmax.f32 %v445_v17, 0.0 }
  0xfb   : > { %586 = vst [vmem:[%s883_s30 + $0xd0] sm:$0xff] %v554_v16  ;;  %v555_v27 = vmax.f32 %v509_v18, 0.0  ;;  %568 = vst [vmem:[%s883_s30 + $0x40] sm:$0xff] %v536_v22  ;;  %v537_v28 = vmax.f32 %v437_v24, 0.0 }
  0xfc   : > { %584 = vst [vmem:[%s883_s30 + $0xc0] sm:$0xff] %v552_v23  ;;  %v553_v29 = vmax.f32 %v501_v25, 0.0  ;;  %571 = vst [vmem:[%s883_s30 + $0x58] sm:$0xff] %v539_v26 }
  0xfd   : > { %587 = vst [vmem:[%s883_s30 + $0xd8] sm:$0xff] %v555_v27  ;;  %569 = vst [vmem:[%s883_s30 + $0x48] sm:$0xff] %v537_v28  ;;  %v734_v30 = vpop.f32.mrb[12].mxu0 }
  0xfe   : > { %585 = vst [vmem:[%s883_s30 + $0xc8] sm:$0xff] %v553_v29  ;;  %v750_v31 = vpop.f32.mrb[12].mxu1  ;;  %v458_v32 = vadd.f32 %v734_v30, %v875_v20  ;;  %v449_v34 = vpop.f32.mrb[13].mxu0 }
  0xff   : > { %v522_v33 = vadd.f32 %v750_v31, %v875_v20  ;;  %v513_v35 = vpop.f32.mrb[13].mxu1  ;;  %v450_v36 = vadd.f32 %v875_v20, %v449_v34  ;;  %v735_v38 = vpop.f32.mrb[14].mxu0 }
 0x100   : > { %v514_v37 = vadd.f32 %v875_v20, %v513_v35  ;;  %v751_v39 = vpop.f32.mrb[14].mxu1  ;;  %v542_v40 = vmax.f32 %v458_v32, 0.0  ;;  %v461_v42 = vadd.f32 %v735_v38, %v875_v20  ;;  %v452_v44 = vpop.f32.mrb[15].mxu0 }
 0x101   : > { %v558_v41 = vmax.f32 %v522_v33, 0.0  ;;  %v525_v43 = vadd.f32 %v751_v39, %v875_v20  ;;  %v516_v45 = vpop.f32.mrb[15].mxu1  ;;  %v540_v46 = vmax.f32 %v450_v36, 0.0  ;;  %v453_v48 = vadd.f32 %v875_v20, %v452_v44 }
 0x102   : > { %v556_v47 = vmax.f32 %v514_v37, 0.0  ;;  %v517_v49 = vadd.f32 %v875_v20, %v516_v45  ;;  %574 = vst [vmem:[%s883_s30 + $0x70] sm:$0xff] %v542_v40  ;;  %v543_v50 = vmax.f32 %v461_v42, 0.0 }
 0x103   : > { %590 = vst [vmem:[%s883_s30 + $0xf0] sm:$0xff] %v558_v41  ;;  %v559_v51 = vmax.f32 %v525_v43, 0.0  ;;  %572 = vst [vmem:[%s883_s30 + $0x60] sm:$0xff] %v540_v46  ;;  %v541_v52 = vmax.f32 %v453_v48, 0.0 }
 0x104   : > { %588 = vst [vmem:[%s883_s30 + $0xe0] sm:$0xff] %v556_v47  ;;  %v557_v53 = vmax.f32 %v517_v49, 0.0  ;;  %575 = vst [vmem:[%s883_s30 + $0x78] sm:$0xff] %v543_v50 }
 0x105   : > { %591 = vst [vmem:[%s883_s30 + $0xf8] sm:$0xff] %v559_v51  ;;  %573 = vst [vmem:[%s883_s30 + $0x68] sm:$0xff] %v541_v52 }
 0x106   : > { %589 = vst [vmem:[%s883_s30 + $0xe8] sm:$0xff] %v557_v53 }
 0x107 PF: > { %s13_s12 = sadd.s32 1, %s793_s12  }
 0x108   : > { %p10_p4 = scmp.ge.s32.totalorder %s13_s12, 4  }
 0x10a   :  { %12 = sbr.rel (!%p10_p4) target bundleno = 1 (0x1), region = 62 }

</bundles_post_ra>
